<compile_context>
chip_gen: v7x
topology: tpu7x:2x2x1
jax: 0.10.0
libtpu: 0.0.40
codegen_flags: <defaults>
</compile_context>

<pallas_src>
import math
from typing import NamedTuple, Optional

import jax
import jax.numpy as jnp
from jax.experimental import pallas as pl
from jax.experimental.pallas import tpu as pltpu


# ----------------------------------------------------------------------------
# Small helpers
# ----------------------------------------------------------------------------

_SQRT_2_OVER_PI = math.sqrt(2.0 / math.pi)
_INV_SQRT2 = 1.0 / math.sqrt(2.0)


def _gelu_tanh(x):
    # tanh-approximate GELU: one EUP tanh + a few VALU ops per element.
    # (PyTorch nn.GELU() default is exact erf; the deviation is <~1e-3 and is
    #  below the bf16-operand matmul error.)  Computed in f32 so it is valid
    #  on v5e as well (no bf16 VPU/EUP there).
    return 0.5 * x * (1.0 + jnp.tanh(_SQRT_2_OVER_PI * (x + 0.044715 * x * x * x)))


def _gelu_erf(x):
    # Exact-erf GELU, used only by the pure-JAX reference (PyTorch semantics).
    return 0.5 * x * (1.0 + jax.lax.erf(x * _INV_SQRT2))


def _round_up(x, m):
    return ((x + m - 1) // m) * m


def _cdiv(a, b):
    return -(-a // b)


def _query_vmem_bytes():
    # One-time, import-side hardware query.  Fallback is the v7x minimum
    # (64 MiB); a failed query only makes the tiling more conservative.
    try:
        info = pltpu.get_tpu_info()
        cap = int(getattr(info, "vmem_capacity_bytes", 0))
        if cap > 0:
            return cap
    except Exception:
        pass
    return 64 * 1024 * 1024


_VMEM_PHYSICAL_BYTES = _query_vmem_bytes()


# ----------------------------------------------------------------------------
# Kernels
# ----------------------------------------------------------------------------

def _mlp_resident_kernel(x_ref, w1_ref, b1_ref, w2_ref, b2_ref, o_ref):
    """Weight-resident path: one (tile_m, Cp) token tile, full W1/W2 in VMEM.

    x_ref : (tile_m, Cp)  bf16
    w1_ref: (Cp, D2p)     bf16   (constant block -> DMA'd once, stays resident)
    b1_ref: (1, D2p)      f32
    w2_ref: (D2p, Cp)     bf16   (constant block)
    b2_ref: (1, Cp)       f32
    o_ref : (tile_m, Cp)  out dtype
    """
    h = jnp.dot(x_ref[...], w1_ref[...], preferred_element_type=jnp.float32)
    h = _gelu_tanh(h + b1_ref[...])
    # TODO(synk): dropout is identity (eval semantics); training parity would
    # mask here using pltpu.prng_seed / pltpu.prng_random_bits.
    y = jnp.dot(h.astype(jnp.bfloat16), w2_ref[...],
                preferred_element_type=jnp.float32)
    o_ref[...] = (y + b2_ref[...]).astype(o_ref.dtype)


def _mlp_stream_kernel(x_ref, w1_ref, b1_ref, w2_ref, b2_ref, o_ref, acc_ref):
    """Streaming fallback (huge hidden dim): hidden-dim chunks on grid axis 1.

    x_ref : (tile_m, Cp)   bf16  (same block across k -> stays resident)
    w1_ref: (Cp, tile_k)   bf16
    b1_ref: (1, tile_k)    f32
    w2_ref: (tile_k, Cp)   bf16
    b2_ref: (1, Cp)        f32
    o_ref : (tile_m, Cp)   out dtype (written at k == last)
    acc_ref: (tile_m, Cp)  f32 VMEM accumulator scratch
    """
    k = pl.program_id(1)

    @pl.when(k == 0)
    def _():
        acc_ref[...] = jnp.zeros_like(acc_ref)

    h = jnp.dot(x_ref[...], w1_ref[...], preferred_element_type=jnp.float32)
    h = _gelu_tanh(h + b1_ref[...])
    acc_ref[...] += jnp.dot(h.astype(jnp.bfloat16), w2_ref[...],
                            preferred_element_type=jnp.float32)

    @pl.when(k == pl.num_programs(1) - 1)
    def _():
        o_ref[...] = (acc_ref[...] + b2_ref[...]).astype(o_ref.dtype)


# ----------------------------------------------------------------------------
# Tiling plan (byte-budgeted, generation-aware)
# ----------------------------------------------------------------------------

def _resident_vmem(tile_m, cp, d2p, out_itemsize):
    return (2 * tile_m * cp * 2                 # x tile, double-buffered bf16
            + 2 * tile_m * cp * out_itemsize    # output tile, double-buffered
            + 2 * (cp * d2p + d2p * cp) * 2     # W1 + W2 (bf16, 2 buffers each)
            + 2 * (d2p + cp) * 4                # biases (f32)
            + 2 * tile_m * d2p * 4)             # f32 hidden (+ GELU temp headroom)


def _streaming_vmem(tile_m, tile_k, cp, out_itemsize):
    return (2 * tile_m * cp * 2
            + 2 * tile_m * cp * out_itemsize
            + 2 * (cp * tile_k + tile_k * cp) * 2
            + 2 * (tile_k + cp) * 4
            + tile_m * cp * 4                   # f32 accumulator scratch
            + 2 * tile_m * tile_k * 4)          # f32 hidden chunk headroom


def _plan_tiles(T, cp, d2p, out_itemsize, budget, tile_m_max, force_streaming):
    tp128 = _round_up(max(T, 1), 128)
    tile_m_cap = max(128, min(_round_up(tile_m_max, 128), tp128))
    if tp128 >= 256:
        # Keep >= 2 token tiles so the "parallel" token axis can shard across
        # v7x's two TensorCores (cheap on single-TC chips: weights stay
        # resident, only ~0.35 us/step of extra grid overhead).
        tile_m_cap = min(tile_m_cap, max(128, _round_up(_cdiv(T, 2), 128)))

    if not force_streaming and _resident_vmem(128, cp, d2p, out_itemsize) <= budget:
        tile_m = 128
        while (tile_m + 128 <= tile_m_cap
               and _resident_vmem(tile_m + 128, cp, d2p, out_itemsize) <= budget):
            tile_m += 128
        return "resident", tile_m, None

    # Hidden-dim streaming fallback.  Prefer 256-multiples for tile_k
    # (v6e/v7x MXUs are 2x256^2); 128 only as last resort (fine on v5e).
    tile_k = 128
    for cand in (1024, 768, 512, 256):
        if (cand <= d2p and d2p % cand == 0
                and _streaming_vmem(128, cand, cp, out_itemsize) <= budget):
            tile_k = cand
            break
    tile_m = 128
    while (tile_m + 128 <= tile_m_cap
           and _streaming_vmem(tile_m + 128, tile_k, cp, out_itemsize) <= budget):
        tile_m += 128
    return "stream", tile_m, tile_k


# ----------------------------------------------------------------------------
# Parameter preparation (done ONCE, hoisted out of the per-call path)
# ----------------------------------------------------------------------------

class MLPParams(NamedTuple):
    w1: jax.Array   # (Cp, D2p) bf16
    b1: jax.Array   # (1, D2p)  f32
    w2: jax.Array   # (D2p, Cp) bf16
    b2: jax.Array   # (1, Cp)   f32
    c: int
    d2: int


def prepare_params(w1, b1, w2, b2) -> MLPParams:
    """Pad to lane-dense (128-multiple) shapes and cast to bf16, once."""
    C, D2 = w1.shape
    cp = _round_up(max(C, 128), 128)
    d2p = _round_up(max(D2, 128), 128)
    w1_p = jnp.zeros((cp, d2p), jnp.bfloat16).at[:C, :D2].set(
        jnp.asarray(w1, jnp.bfloat16))
    b1_p = jnp.zeros((1, d2p), jnp.float32).at[:, :D2].set(
        jnp.asarray(b1, jnp.float32).reshape(1, D2))
    w2_p = jnp.zeros((d2p, cp), jnp.bfloat16).at[:D2, :C].set(
        jnp.asarray(w2, jnp.bfloat16))
    b2_p = jnp.zeros((1, cp), jnp.float32).at[:, :C].set(
        jnp.asarray(b2, jnp.float32).reshape(1, C))
    return MLPParams(w1_p, b1_p, w2_p, b2_p, C, D2)


# ----------------------------------------------------------------------------
# Wrappers
# ----------------------------------------------------------------------------

def transformer_mlp_tokens(tokens, params: MLPParams, *,
                           out_dtype: Optional[jnp.dtype] = None,
                           tile_m_max: int = 2048,
                           force_streaming: bool = False):
    """MLP over a channels-last (T, C) token matrix (no layout glue)."""
    T, C = tokens.shape
    if C != params.c:
        raise ValueError(f"channel mismatch: tokens C={C}, params C={params.c}")
    out_dtype = jnp.dtype(tokens.dtype if out_dtype is None else out_dtype)
    out_itemsize = out_dtype.itemsize
    cp, d2p = params.w1.shape
    D2 = params.d2

    budget = int(_VMEM_PHYSICAL_BYTES * 0.8)
    path, tile_m, tile_k = _plan_tiles(T, cp, d2p, out_itemsize, budget,
                                       tile_m_max, force_streaming)
    Tp = _round_up(T, tile_m)
    n_m = Tp // tile_m

    # Activations: bf16 cast always; zero-pad only when shapes are unaligned.
    xt = tokens.astype(jnp.bfloat16)
    if T != Tp or C != cp:
        xt = jnp.zeros((Tp, cp), jnp.bfloat16).at[:T, :C].set(xt)

    flops = 4 * T * C * D2                       # two matmuls (real dims)
    weight_bytes = 2 * C * D2 * 2 + D2 * 4 + C * 4
    weight_passes = 1 if path == "resident" else n_m
    cost = pl.CostEstimate(
        flops=int(flops),
        transcendentals=int(T * D2),
        bytes_accessed=int(T * C * 2 + T * C * out_itemsize
                           + weight_passes * weight_bytes),
    )

    if path == "resident":
        needed = _resident_vmem(tile_m, cp, d2p, out_itemsize)
        vmem_limit = int(min(int(0.9 * _VMEM_PHYSICAL_BYTES),
                             max(32 * 1024 * 1024, 2 * needed)))
        call = pl.pallas_call(
            _mlp_resident_kernel,
            out_shape=jax.ShapeDtypeStruct((Tp, cp), out_dtype),
            grid_spec=pltpu.PrefetchScalarGridSpec(
                num_scalar_prefetch=0,
                grid=(n_m,),
                in_specs=[
                    pl.BlockSpec((tile_m, cp), lambda i: (i, 0)),   # token tile
                    pl.BlockSpec((cp, d2p), lambda i: (0, 0)),      # W1 (resident)
                    pl.BlockSpec((1, d2p), lambda i: (0, 0)),       # b1
                    pl.BlockSpec((d2p, cp), lambda i: (0, 0)),      # W2 (resident)
                    pl.BlockSpec((1, cp), lambda i: (0, 0)),        # b2
                ],
                out_specs=pl.BlockSpec((tile_m, cp), lambda i: (i, 0)),
            ),
            compiler_params=pltpu.CompilerParams(
                dimension_semantics=("parallel",),
                vmem_limit_bytes=vmem_limit,
            ),
            cost_estimate=cost,
        )
    else:
        n_k = d2p // tile_k
        needed = _streaming_vmem(tile_m, tile_k, cp, out_itemsize)
        vmem_limit = int(min(int(0.9 * _VMEM_PHYSICAL_BYTES),
                             max(32 * 1024 * 1024, 2 * needed)))
        call = pl.pallas_call(
            _mlp_stream_kernel,
            out_shape=jax.ShapeDtypeStruct((Tp, cp), out_dtype),
            grid_spec=pltpu.PrefetchScalarGridSpec(
                num_scalar_prefetch=0,
                grid=(n_m, n_k),
                in_specs=[
                    pl.BlockSpec((tile_m, cp), lambda i, k: (i, 0)),  # token tile
                    pl.BlockSpec((cp, tile_k), lambda i, k: (0, k)),  # W1 chunk
                    pl.BlockSpec((1, tile_k), lambda i, k: (0, k)),   # b1 chunk
                    pl.BlockSpec((tile_k, cp), lambda i, k: (k, 0)),  # W2 chunk
                    pl.BlockSpec((1, cp), lambda i, k: (0, 0)),       # b2
                ],
                out_specs=pl.BlockSpec((tile_m, cp), lambda i, k: (i, 0)),
                scratch_shapes=[pltpu.VMEM((tile_m, cp), jnp.float32)],
            ),
            compiler_params=pltpu.CompilerParams(
                dimension_semantics=("parallel", "arbitrary"),
                vmem_limit_bytes=vmem_limit,
            ),
            cost_estimate=cost,
        )

    out_p = call(xt, params.w1, params.b1, params.w2, params.b2)
    if T != Tp or C != cp:
        out_p = out_p[:T, :C]
    return out_p


def transformer_mlp(x_nchw, params: MLPParams, *, out_dtype=None):
    # NOTE: the two transposes below are pure layout glue required by the NCHW
    # module contract; if the surrounding model keeps activations channels
    # last / (T, C), call transformer_mlp_tokens directly and skip both HBM
    # round-trips.
    B, C, H, W = x_nchw.shape
    tokens = jnp.transpose(x_nchw, (0, 2, 3, 1)).reshape(B * H * W, C)
    out_tokens = transformer_mlp_tokens(tokens, params, out_dtype=out_dtype)
    return jnp.transpose(out_tokens.reshape(B, H, W, C), (0, 3, 1, 2))


# ----------------------------------------------------------------------------
# Reference (PyTorch semantics: exact-erf GELU, f32) + demo
# ----------------------------------------------------------------------------

def init_params(key, channels, expansion):
    """Deterministic PyTorch-style Linear init: U(-1/sqrt(fan_in), 1/sqrt(fan_in))."""
    d1, d2 = channels, channels * expansion
    k1, k2, k3, k4 = jax.random.split(key, 4)
    bnd1 = 1.0 / math.sqrt(d1)
    bnd2 = 1.0 / math.sqrt(d2)
    w1 = jax.random.uniform(k1, (d1, d2), jnp.float32, -bnd1, bnd1)
    b1 = jax.random.uniform(k2, (1, d2), jnp.float32, -bnd1, bnd1)
    w2 = jax.random.uniform(k3, (d2, d1), jnp.float32, -bnd2, bnd2)
    b2 = jax.random.uniform(k4, (1, d1), jnp.float32, -bnd2, bnd2)
    return w1, b1, w2, b2


def reference_mlp(x_nchw, w1, b1, w2, b2):
    B, C, H, W = x_nchw.shape
    t = jnp.transpose(x_nchw, (0, 2, 3, 1)).reshape(B * H * W, C)
    h = _gelu_erf(t @ w1 + b1)
    y = h @ w2 + b2
    return jnp.transpose(y.reshape(B, H, W, C), (0, 3, 1, 2))


if __name__ == "__main__":
    B, C, H, W = 2, 4, 16, 16
    expansion = 2  # drop = 0.0 (identity)

    key = jax.random.PRNGKey(0)
    kx, kp = jax.random.split(key)
    x = jax.random.normal(kx, (B, C, H, W), jnp.float32)
    w1, b1, w2, b2 = init_params(kp, C, expansion)

    # Pad + bf16-cast the weights ONCE (reused across forwards).
    params = prepare_params(w1, b1, w2, b2)

    out = jax.block_until_ready(transformer_mlp(x, params))
    ref = reference_mlp(x, w1, b1, w2, b2)
    assert out.shape == (B, C, H, W)
    # bf16 matmul operands + tanh-approx GELU vs exact-erf f32 reference.
    assert jnp.allclose(out, ref, atol=3e-2, rtol=3e-2)

    # Padding path: token count not a multiple of the tile.
    x2 = jax.random.normal(jax.random.PRNGKey(1), (1, C, 5, 7), jnp.float32)
    out2 = jax.block_until_ready(transformer_mlp(x2, params))
    ref2 = reference_mlp(x2, w1, b1, w2, b2)
    assert out2.shape == (1, C, 5, 7)
    assert jnp.allclose(out2, ref2, atol=3e-2, rtol=3e-2)

    # Also exercise the hidden-dim streaming fallback kernel (used when the
    # padded weights would not fit the VMEM budget).
    tokens = jnp.transpose(x, (0, 2, 3, 1)).reshape(B * H * W, C)
    out3 = jax.block_until_ready(
        transformer_mlp_tokens(tokens, params, force_streaming=True))
    ref3 = jnp.transpose(ref, (0, 2, 3, 1)).reshape(B * H * W, C)
    assert jnp.allclose(out3, ref3, atol=3e-2, rtol=3e-2)

    print("KERNEL_OK")
</pallas_src>

<mosaic_0001>
module attributes {stable_mosaic.version = 11 : i64} {
  func.func @_mlp_resident_kernel(%arg0: i32, %arg1: memref<256x128xbf16, #tpu.memory_space<vmem>>, %arg2: memref<128x128xbf16, #tpu.memory_space<vmem>>, %arg3: memref<1x128xf32, #tpu.memory_space<vmem>>, %arg4: memref<128x128xbf16, #tpu.memory_space<vmem>>, %arg5: memref<1x128xf32, #tpu.memory_space<vmem>>, %arg6: memref<256x128xf32, #tpu.memory_space<vmem>>) attributes {dimension_semantics = [#tpu.dimension_semantics<parallel>], iteration_bounds = array<i64: 2>, scalar_prefetch = 0 : i64, scratch_operands = 0 : i64, tpu.core_type = #tpu.core_type<tc>, window_params = [{transform_indices = @transform_0, window_bounds = array<i64: 256, 128>}, {pipeline_mode = #tpu.pipeline_mode<synchronous>, transform_indices = @transform_1, window_bounds = array<i64: 128, 128>}, {pipeline_mode = #tpu.pipeline_mode<synchronous>, transform_indices = @transform_2, window_bounds = array<i64: 1, 128>}, {pipeline_mode = #tpu.pipeline_mode<synchronous>, transform_indices = @transform_3, window_bounds = array<i64: 128, 128>}, {pipeline_mode = #tpu.pipeline_mode<synchronous>, transform_indices = @transform_4, window_bounds = array<i64: 1, 128>}, {transform_indices = @transform_5, window_bounds = array<i64: 256, 128>}]} {
    %c0 = arith.constant 0 : index
    %c0_0 = arith.constant 0 : index
    %0 = vector.load %arg1[%c0, %c0_0] : memref<256x128xbf16, #tpu.memory_space<vmem>>, vector<256x128xbf16>
    %c0_1 = arith.constant 0 : index
    %c0_2 = arith.constant 0 : index
    %1 = vector.load %arg2[%c0_1, %c0_2] : memref<128x128xbf16, #tpu.memory_space<vmem>>, vector<128x128xbf16>
    %cst = arith.constant dense<0.000000e+00> : vector<256x128xf32>
    %2 = tpu.matmul %0, %1, %cst {dimension_numbers = #tpu.dot_dimension_numbers<[1], [0], [0], [1], [0, 0, 1, 1], [], []>} : vector<256x128xbf16>, vector<128x128xbf16>, vector<256x128xf32> -> vector<256x128xf32>
    %c0_3 = arith.constant 0 : index
    %c0_4 = arith.constant 0 : index
    %3 = vector.load %arg3[%c0_3, %c0_4] : memref<1x128xf32, #tpu.memory_space<vmem>>, vector<1x128xf32>
    %4 = vector.broadcast %3 : vector<1x128xf32> to vector<256x128xf32>
    %5 = arith.addf %2, %4 : vector<256x128xf32>
    %cst_5 = arith.constant 5.000000e-01 : f32
    %6 = vector.broadcast %cst_5 : f32 to vector<256x128xf32>
    %7 = arith.mulf %6, %5 : vector<256x128xf32>
    %cst_6 = arith.constant 4.471500e-02 : f32
    %8 = vector.broadcast %cst_6 : f32 to vector<256x128xf32>
    %9 = arith.mulf %8, %5 : vector<256x128xf32>
    %10 = arith.mulf %9, %5 : vector<256x128xf32>
    %11 = arith.mulf %10, %5 : vector<256x128xf32>
    %12 = arith.addf %5, %11 : vector<256x128xf32>
    %cst_7 = arith.constant 0.797884583 : f32
    %13 = vector.broadcast %cst_7 : f32 to vector<256x128xf32>
    %14 = arith.mulf %13, %12 : vector<256x128xf32>
    %15 = math.tanh %14 : vector<256x128xf32>
    %cst_8 = arith.constant 1.000000e+00 : f32
    %16 = vector.broadcast %cst_8 : f32 to vector<256x128xf32>
    %17 = arith.addf %16, %15 : vector<256x128xf32>
    %18 = arith.mulf %7, %17 : vector<256x128xf32>
    %19 = arith.truncf %18 : vector<256x128xf32> to vector<256x128xbf16>
    %c0_9 = arith.constant 0 : index
    %c0_10 = arith.constant 0 : index
    %20 = vector.load %arg4[%c0_9, %c0_10] : memref<128x128xbf16, #tpu.memory_space<vmem>>, vector<128x128xbf16>
    %cst_11 = arith.constant dense<0.000000e+00> : vector<256x128xf32>
    %21 = tpu.matmul %19, %20, %cst_11 {dimension_numbers = #tpu.dot_dimension_numbers<[1], [0], [0], [1], [0, 0, 1, 1], [], []>} : vector<256x128xbf16>, vector<128x128xbf16>, vector<256x128xf32> -> vector<256x128xf32>
    %c0_12 = arith.constant 0 : index
    %c0_13 = arith.constant 0 : index
    %22 = vector.load %arg5[%c0_12, %c0_13] : memref<1x128xf32, #tpu.memory_space<vmem>>, vector<1x128xf32>
    %23 = vector.broadcast %22 : vector<1x128xf32> to vector<256x128xf32>
    %24 = arith.addf %21, %23 : vector<256x128xf32>
    %c0_14 = arith.constant 0 : index
    %c0_15 = arith.constant 0 : index
    %25 = vector.load %arg6[%c0_14, %c0_15] : memref<256x128xf32, #tpu.memory_space<vmem>>, vector<256x128xf32>
    tpu.vector_store %arg6[%c0_14, %c0_15], %24 {strides = array<i32>} : memref<256x128xf32, #tpu.memory_space<vmem>>, vector<256x128xf32>,
    return
  }
  func.func @transform_0(%arg0: i32) -> (i32, i32) {
    %c0_i32 = arith.constant 0 : i32
    %c0_i32_0 = arith.constant 0 : i32
    return %arg0, %c0_i32 : i32, i32
  }
  func.func @transform_1(%arg0: i32) -> (i32, i32) {
    %c0_i32 = arith.constant 0 : i32
    %c0_i32_0 = arith.constant 0 : i32
    %c0_i32_1 = arith.constant 0 : i32
    return %c0_i32, %c0_i32_0 : i32, i32
  }
  func.func @transform_2(%arg0: i32) -> (i32, i32) {
    %c0_i32 = arith.constant 0 : i32
    %c0_i32_0 = arith.constant 0 : i32
    %c0_i32_1 = arith.constant 0 : i32
    return %c0_i32, %c0_i32_0 : i32, i32
  }
  func.func @transform_3(%arg0: i32) -> (i32, i32) {
    %c0_i32 = arith.constant 0 : i32
    %c0_i32_0 = arith.constant 0 : i32
    %c0_i32_1 = arith.constant 0 : i32
    return %c0_i32, %c0_i32_0 : i32, i32
  }
  func.func @transform_4(%arg0: i32) -> (i32, i32) {
    %c0_i32 = arith.constant 0 : i32
    %c0_i32_0 = arith.constant 0 : i32
    %c0_i32_1 = arith.constant 0 : i32
    return %c0_i32, %c0_i32_0 : i32, i32
  }
  func.func @transform_5(%arg0: i32) -> (i32, i32) {
    %c0_i32 = arith.constant 0 : i32
    %c0_i32_0 = arith.constant 0 : i32
    return %arg0, %c0_i32 : i32, i32
  }
}

</mosaic_0001>

<bundles_post_ra>
// kernel: tpu_custom_call.1
= control target key start
LH: loop header
LB: loop body
LE: loop exit
PB: predicated region body
PF: predicated region fallthrough
CT: control target
= control target key end

     0   :  { %10 = vsyncpa [#allocation3], 0  ;;  %s2468_s0 = inlined_call_operand.hbm [shape: bf16[512,128], index: 0, kind: input, shape index: {}]   ;;  %s2469_s1 = inlined_call_operand.hbm [shape: bf16[128,128], index: 1, kind: input, shape index: {}]   ;;  %s2470_s2 = inlined_call_operand.vmem [shape: f32[1,128], index: 2, kind: input, shape index: {}]   ;;  %s2471_s3 = inlined_call_operand.hbm [shape: bf16[128,128], index: 3, kind: input, shape index: {}]   ;;  %s2472_s4 = inlined_call_operand.vmem [shape: f32[1,128], index: 4, kind: input, shape index: {}]   ;;  %s2473_s5 = inlined_call_operand.hbm [shape: f32[512,128], index: 5, kind: output, shape index: {}]  }
   0x1   :  { %12 = vsyncpa [#allocation3 + $0x1], 0 }
   0x2   :  { %13 = vsyncpa [#allocation6], 0 }
   0x3   :  { %14 = vsyncpa [#allocation4], 0 }
   0x4   :  { %16 = vsyncpa [#allocation4 + $0x1], 0  ;;  %s1870_s18 = smov 0   ;;  %s1872_s19 = smov 0  }
   0x5   :  { %s1874_s20 = smov 0   ;;  %s1876_s21 = smov 0  }
   0x6 LB: > { %s1891_s22 = sadd.s32 4294967295, %s1830_s21   ;;  %s1309_s23 = sadd.s32 4294967294, %s1830_s21   ;;  %s1830_s21 = sphi %s1876_s21, %s2493_s21   ;;  %s1826_s20 = sphi %s1874_s20, %s2492_s20   ;;  %s1822_s19 = sphi %s1872_s19, %s2491_s19   ;;  %s1818_s18 = sphi %s1870_s18, %s2490_s18  }
   0x7   : > { %p42_p0 = scmp.ne.s32.totalorder %s1822_s19, %s1818_s18  ;;  %p2474_p1 = scmp.eq.s32.totalorder %s1891_s22, 0 }
   0x8   : > { %p156_p3 = scmp.eq.s32.totalorder %s1309_s23, 1  ;;  %p1310_p5 = scmp.ge.s32.totalorder %s1830_s21, 1 }
   0x9   : > { %p1900_p4 = por %p2474_p1, %p42_p0  ;;  %p163_p7 = scmp.lt.s32.totalorder %s1830_s21, 3 }
   0xa   : > { %p1905_p6 = por %p156_p3, %p42_p0  ;;  %s1832_s27 = smov [#allocation5]  }
   0xb   : > { %s2477_s24 = scalar_select %p1900_p4, 1, 0 }
   0xc   : > { %s2478_s25 = scalar_select %p1905_p6, 1, 0 }
   0xd   : > { %p1910_p8 = pnand %p1310_p5, %p163_p7  ;;  %s175_s28 = sshll.u32 %s1832_s27, 4  ;;  %s1914_s28 = int_to_ptr.vmem [resolvable:$true] %s175_s28 }
   0xe   : > { %s1833_s30 = smov [#allocation7]   ;;  %s1674_s9 = scalar_lea.hbm %s2469_s1, 1024 }
   0xf   : > { %p1519_p9 = pneg %p1910_p8  ;;  %s191_s6 = sshll.u32 %s1833_s30, 4  ;;  %s1925_s6 = int_to_ptr.vmem [resolvable:$true] %s191_s6 }
  0x10   : > { %p1675_p12 = scmp.ne.s32.totalorder %s2469_s1, %s1674_s9  ;;  %p1681_p5 = scmp.lt.u32.totalorder %s1674_s9, %s2469_s1 }
  0x11   : > { %p1921_p11 = pnand %p1519_p9, %p2474_p1 }
  0x13   : > { %p1676_p13 = pneg %p1921_p11 }
  0x15   : > { %p1677_p0 = pnand %p1676_p13, %p1675_p12 }
  0x17   : > { %p1678_p3 = pneg %p1677_p0 }
  0x19   : > { %p1683_p7 = pnand %p1681_p5, %p1678_p3 }
  0x1b   : > { %1686 = shalt.err (!%p1683_p7)
}
  0x1c   : > { %s1687_s14 = scalar_lea.vmem %s1914_s28, 1024  ;;  %p1695_p2 = scmp.lt.s32.totalorder %s1914_s28, %s1914_s28 }
  0x1d   : > { %p1688_p9 = scmp.ne.s32.totalorder %s1914_s28, %s1687_s14  ;;  %p1696_p12 = scmp.lt.s32.totalorder %s1687_s14, %s1687_s14 }
  0x1f   : > { %p1690_p10 = pnand %p1688_p9, %p1676_p13  ;;  %p1697_p0 = por %p1696_p12, %p1695_p2 }
  0x21   : > { %p1691_p1 = pneg %p1690_p10 }
  0x23   : > { %p1698_p6 = pnand %p1697_p0, %p1691_p1 }
  0x25   : > { %1701 = shalt.err (!%p1698_p6)
}
  0x26   : > { %s1834_s15 = smov 64   ;;  %s1835_s16 = smov 4  }
  0x27   : > { %1522 = dma.hbm_to_vmem [thread:$0]  (!%p1921_p11), %s2469_s1, 1024, %s1914_s28, [#allocation6], %s1834_s15, %s1834_s15, %s1835_s16  }
  0x28   : > { %s1702_s7 = scalar_lea.hbm %s2471_s3, 1024 }
  0x29   : > { %p1703_p1 = scmp.ne.s32.totalorder %s2471_s3, %s1702_s7  ;;  %p1709_p10 = scmp.lt.u32.totalorder %s1702_s7, %s2471_s3 }
  0x2b   : > { %p1705_p2 = pnand %p1703_p1, %p1676_p13 }
  0x2d   : > { %p1706_p6 = pneg %p1705_p2 }
  0x2f   : > { %p1711_p3 = pnand %p1709_p10, %p1706_p6 }
  0x31   : > { %1714 = shalt.err (!%p1711_p3)
}
  0x32   : > { %s1715_s28 = scalar_lea.vmem %s1925_s6, 1024  ;;  %p1723_p12 = scmp.lt.s32.totalorder %s1925_s6, %s1925_s6 }
  0x33   : > { %p1716_p5 = scmp.ne.s32.totalorder %s1925_s6, %s1715_s28  ;;  %p1724_p0 = scmp.lt.s32.totalorder %s1715_s28, %s1715_s28 }
  0x35   : > { %p1718_p7 = pnand %p1716_p5, %p1676_p13  ;;  %p1725_p1 = por %p1724_p0, %p1723_p12 }
  0x37   : > { %p1719_p9 = pneg %p1718_p7 }
  0x39   : > { %p1726_p2 = pnand %p1725_p1, %p1719_p9 }
  0x3b   : > { %1729 = shalt.err (!%p1726_p2)
}
  0x3c   : > { %1525 = dma.hbm_to_vmem [thread:$0]  (!%p1921_p11), %s2471_s3, 1024, %s1925_s6, [#allocation6], %s1834_s15, %s1834_s15, %s1835_s16  }
  0x3d   : > { %s1986_s29 = sadd.s32 1, %s1830_s21   ;;  %s29_s14 = sadd.s32 1, %s1826_s20 }
  0x3e   : > { %s26_s17 = ssub.s32 %s1830_s21, %s1986_s29  ;;  %p36_p13 = scmp.ne.s32.totalorder %s1826_s20, %s1822_s19 }
  0x3f   : > { %p27_p6 = scmp.eq.s32.totalorder %s26_s17, 0  ;;  %p37_p10 = scmp.eq.s32.totalorder %s1830_s21, 0 }
  0x40   : > { %p2481_p3 = scmp.eq.s32.totalorder %s1891_s22, 1  ;;  %p1536_p7 = scmp.lt.s32.totalorder %s1830_s21, 2 }
  0x41   : > { %s2002_s27 = scalar_select %p27_p6, %s1826_s20, %s29_s14  }
  0x42   : > { %p1996_p5 = por %p2481_p3, %p36_p13  ;;  %p38_p9 = por %p37_p10, %p36_p13 }
  0x43   : > { %s208_s30 = sand.u32 1, %s1826_s20   ;;  %s1361_s6 = sshll.u32 %s1830_s21, 11 }
  0x44   : > { %s2482_s23 = scalar_select %p1996_p5, 1, 0 }
  0x45   : > { %s1314_s7 = sshll.u32 %s208_s30, 7  ;;  %s2009_s10 = scalar_lea.hbm %s2468_s0, %s1361_s6 }
  0x46   : > { %s212_s11 = scalar_lea.vmem [#allocation2], %s1314_s7  ;;  %p2013_p11 = pnand %p1536_p7, %p38_p9 }
  0x47   : > { %s219_s28 = sshll.u32 %s212_s11, 4  ;;  %s2017_s13 = scalar_lea.sflag [#allocation3], %s208_s30  ;;  %s2011_s28 = int_to_ptr.vmem [resolvable:$true] %s219_s28 }
  0x48   : > { %s1730_s14 = scalar_lea.hbm %s2009_s10, 2048  ;;  %p1732_p0 = pneg %p2013_p11 }
  0x49   : > { %p1731_p12 = scmp.ne.s32.totalorder %s2009_s10, %s1730_s14  ;;  %s1735_s6 = scalar_lea.hbm %s2468_s0, 4096 }
  0x4a   : > { %p1736_p13 = scmp.lt.u32.totalorder %s2009_s10, %s2468_s0  ;;  %p1737_p6 = scmp.lt.u32.totalorder %s1735_s6, %s1730_s14 }
  0x4b   : > { %p1733_p1 = pnand %p1732_p0, %p1731_p12  ;;  %p1739_p3 = scmp.lt.u32.totalorder %s1730_s14, %s2009_s10 }
  0x4c   : > { %p1738_p10 = por %p1737_p6, %p1736_p13 }
  0x4d   : > { %p1734_p2 = pneg %p1733_p1 }
  0x4e   : > { %p1740_p7 = por %p1739_p3, %p1738_p10 }
  0x50   : > { %p1741_p9 = pnand %p1740_p7, %p1734_p2 }
  0x52   : > { %1744 = shalt.err (!%p1741_p9)
}
  0x53   : > { %s1745_s30 = scalar_lea.vmem %s2011_s28, 2048  ;;  %s1836_s11 = smov [#allocation2]  }
  0x54   : > { %p1746_p12 = scmp.ne.s32.totalorder %s2011_s28, %s1745_s30  ;;  %s1750_s17 = sshll.u32 %s1836_s11, 4  ;;  %s1751_s17 = int_to_ptr.vmem [resolvable:$false] %s1750_s17 }
  0x55   : > { %s1752_s7 = scalar_lea.vmem %s1751_s17, 4096  ;;  %p1753_p4 = scmp.lt.s32.totalorder %s2011_s28, %s1751_s17 }
  0x56   : > { %p1748_p1 = pnand %p1746_p12, %p1732_p0  ;;  %p1754_p13 = scmp.lt.s32.totalorder %s1752_s7, %s1745_s30 }
  0x58   : > { %p1749_p5 = pneg %p1748_p1  ;;  %p1755_p6 = por %p1754_p13, %p1753_p4 }
  0x5a   : > { %p1756_p10 = pnand %p1755_p6, %p1749_p5 }
  0x5c   : > { %1759 = shalt.err (!%p1756_p10)
}
  0x5d   : > { %1529 = dma.hbm_to_vmem [thread:$0]  (!%p2013_p11), %s2009_s10, 2048, %s2011_s28, %s2017_s13, %s1834_s15, %s1834_s15, %s1835_s16  }
  0x5e   : > { %231 = sbr.rel (%p1910_p8) target bundleno = 687 (0x2af), region = 40  ;;  %s2051_s14 = sand.u32 (!%p1910_p8), 1, %s1822_s19  }
  0x5f   : > { %s1318_s6 = sshll.u32 (!%p1910_p8), %s2051_s14, 7  ;;  %s234_s8 = scalar_lea.sflag (!%p1910_p8), [#allocation3], %s2051_s14 }
  0x60   : > { %s2055_s9 = scalar_lea.vmem (!%p1910_p8), [#allocation2], %s1318_s6  ;;  %p2484_p4 = scmp.ne.s32.totalorder (!%p1910_p8), %s2477_s24, 0 }
  0x65   : > { %1805 = dma.done.wait (%p2484_p4), %s234_s8, 2048  }
  0x66   : > { %1807 = vsyncadd (%p2484_p4), %s234_s8, 4294965248  ;;  %p2485_p5 = scmp.eq.s32.totalorder %s1891_s22, 0 }
  0x68   : > { %1809 = dma.done.wait (%p2485_p5), [#allocation6], 2048   ;;  %p2486_p8 = pmov %p2485_p5 }
  0x69   : > { %v1578_v0 = vld [vmem:[#allocation5] sm:$0xff]   ;;  %v1579_v1 = vld [vmem:[#allocation5 + $0x8] sm:$0xff]   ;;  %v1580_v2 = vld [vmem:[#allocation5 + $0x10] sm:$0xff]   ;;  %s1321_s15 = sshll.u32 %s2051_s14, 8  ;;  %s1362_s12 = sshll.u32 %s1891_s22, 12 }
  0x6a   : > { %1811 = vsyncadd (%p2486_p8), [#allocation6], 4294965248  ;;  %1411 = vmatprep.subr.bf16.mxu0 %v1578_v0  ;;  %v1581_v3 = vld [vmem:[#allocation5 + $0x18] sm:$0xff]   ;;  %v1586_v4 = vld [vmem:[%s2055_s9] sm:$0xff]   ;;  %s2353_s28 = scalar_lea.vmem [#allocation8], %s1321_s15  ;;  %s2418_s17 = scalar_lea.hbm %s2473_s5, %s1362_s12 }
  0x6b   : > { %1412 = vmatpush3.bf16.msra.mxu0 %v1578_v0  ;;  %1427 = vmatprep.mubr.bf16.mxu0 %v1586_v4  ;;  %v1582_v5 = vld [vmem:[#allocation5 + $0x20] sm:$0xff]   ;;  %v1583_v6 = vld [vmem:[#allocation5 + $0x28] sm:$0xff]   ;;  %v1584_v7 = vld [vmem:[#allocation5 + $0x30] sm:$0xff]   ;;  %s1217_s13 = sshll.u32 %s2353_s28, 4  ;;  %s1204_s22 = scalar_lea.sflag [#allocation4], %s2051_s14  ;;  %s2420_s13 = int_to_ptr.vmem [resolvable:$true] %s1217_s13 }
  0x6c   : > { %1413 = vmatprep.subr.bf16.mxu0 %v1579_v1  ;;  %v1585_v8 = vld [vmem:[#allocation5 + $0x38] sm:$0xff]   ;;  %v1587_v9 = vld [vmem:[%s2055_s9 + $0x8] sm:$0xff]   ;;  %v1588_v10 = vld [vmem:[%s2055_s9 + $0x10] sm:$0xff]   ;;  %s1760_s7 = scalar_lea.vmem %s2420_s13, 4096  ;;  %p2487_p0 = scmp.ne.s32.totalorder %s2482_s23, 0 }
  0x6d   : > { %v1589_v11 = vld [vmem:[%s2055_s9 + $0x18] sm:$0xff]   ;;  %v1590_v12 = vld [vmem:[%s2055_s9 + $0x20] sm:$0xff]   ;;  %v1591_v13 = vld [vmem:[%s2055_s9 + $0x28] sm:$0xff]   ;;  %p1761_p11 = scmp.ne.s32.totalorder %s2420_s13, %s1760_s7  ;;  %s1837_s6 = smov [#allocation8]  }
  0x6e   : > { %v1592_v14 = vld [vmem:[%s2055_s9 + $0x30] sm:$0xff]   ;;  %v1593_v15 = vld [vmem:[%s2055_s9 + $0x38] sm:$0xff]   ;;  %v1594_v16 = vld [vmem:[%s2055_s9 + $0x40] sm:$0xff]   ;;  %s1764_s8 = sshll.u32 %s1837_s6, 4  ;;  %s1765_s8 = int_to_ptr.vmem [resolvable:$false] %s1764_s8 }
  0x6f   : > { %1414 = vmatpush3.bf16.msra.mxu0 %v1579_v1  ;;  %v1595_v17 = vld [vmem:[%s2055_s9 + $0x48] sm:$0xff]   ;;  %v1596_v18 = vld [vmem:[%s2055_s9 + $0x50] sm:$0xff]   ;;  %v1597_v19 = vld [vmem:[%s2055_s9 + $0x58] sm:$0xff]   ;;  %p1762_p2 = pnand %p1761_p11, %p2487_p0  ;;  %p1767_p7 = scmp.lt.s32.totalorder %s2420_s13, %s1765_s8 }
  0x70   : > { %1415 = vmatprep.subr.bf16.mxu0 %v1580_v2  ;;  %v1598_v20 = vld [vmem:[%s2055_s9 + $0x60] sm:$0xff]   ;;  %v1599_v21 = vld [vmem:[%s2055_s9 + $0x68] sm:$0xff]   ;;  %v1600_v22 = vld [vmem:[%s2055_s9 + $0x70] sm:$0xff]  }
  0x71   : > { %v1601_v23 = vld [vmem:[%s2055_s9 + $0x78] sm:$0xff]   ;;  %v1602_v24 = vld [vmem:[#allocation7] sm:$0xff]   ;;  %v1603_v25 = vld [vmem:[#allocation7 + $0x8] sm:$0xff]   ;;  %p1763_p3 = pneg %p1762_p2  ;;  %s1766_s9 = scalar_lea.vmem %s1765_s8, 8192 }
  0x72   : > { %1459 = vmatprep.subr.bf16.mxu1 %v1602_v24  ;;  %v1604_v26 = vld [vmem:[#allocation7 + $0x10] sm:$0xff]   ;;  %v1605_v27 = vld [vmem:[#allocation7 + $0x18] sm:$0xff]   ;;  %v1606_v28 = vld [vmem:[#allocation7 + $0x20] sm:$0xff]   ;;  %p1768_p9 = scmp.lt.s32.totalorder %s1766_s9, %s1760_s7 }
  0x73   : > { %1416 = vmatpush3.bf16.msra.mxu0 %v1580_v2  ;;  %1460 = vmatpush3.bf16.msra.mxu1 %v1602_v24  ;;  %v1607_v29 = vld [vmem:[#allocation7 + $0x28] sm:$0xff]   ;;  %v1608_v30 = vld [vmem:[#allocation7 + $0x30] sm:$0xff]   ;;  %v1609_v31 = vld [vmem:[#allocation7 + $0x38] sm:$0xff]  }
  0x74   : > { %1417 = vmatprep.subr.bf16.mxu0 %v1581_v3  ;;  %1461 = vmatprep.subr.bf16.mxu1 %v1603_v25  ;;  %v2084_v32 = vld [vmem:[%s2470_s2] ss:$0 sm:$0xff]  ;;  %p1769_p12 = por %p1768_p9, %p1767_p7 }
  0x76   : > { %p1770_p1 = pnand %p1769_p12, %p1763_p3 }
  0x77   : > { %1418 = vmatpush3.bf16.msra.mxu0 %v1581_v3  ;;  %1462 = vmatpush3.bf16.msra.mxu1 %v1603_v25 }
  0x78   : > { %1419 = vmatprep.subr.bf16.mxu0 %v1582_v5  ;;  %1463 = vmatprep.subr.bf16.mxu1 %v1604_v26 }
  0x7b   : > { %1420 = vmatpush3.bf16.msra.mxu0 %v1582_v5  ;;  %1464 = vmatpush3.bf16.msra.mxu1 %v1604_v26 }
  0x7c   : > { %1421 = vmatprep.subr.bf16.mxu0 %v1583_v6  ;;  %1465 = vmatprep.subr.bf16.mxu1 %v1605_v27 }
  0x7f   : > { %1422 = vmatpush3.bf16.msra.mxu0 %v1583_v6  ;;  %1466 = vmatpush3.bf16.msra.mxu1 %v1605_v27 }
  0x80   : > { %1423 = vmatprep.subr.bf16.mxu0 %v1584_v7  ;;  %1467 = vmatprep.subr.bf16.mxu1 %v1606_v28 }
  0x83   : > { %1424 = vmatpush3.bf16.msra.mxu0 %v1584_v7  ;;  %1468 = vmatpush3.bf16.msra.mxu1 %v1606_v28 }
  0x84   : > { %1425 = vmatprep.subr.bf16.mxu0 %v1585_v8  ;;  %1469 = vmatprep.subr.bf16.mxu1 %v1607_v29 }
  0x87   : > { %1426 = vmatpush3.bf16.msra.mxu0 %v1585_v8  ;;  %1470 = vmatpush3.bf16.msra.mxu1 %v1607_v29 }
  0x88   : > { %1471 = vmatprep.subr.bf16.mxu1 %v1608_v30 }
  0x8a   : > { %1428 = vmatmul.mubr.bf16.vlgmr.msra.gmra.mrb[0].mxu0 %v1587_v9 }
  0x8b   : > { %1431 = vmatprep.mubr.bf16.mxu0 %v1588_v10  ;;  %1472 = vmatpush3.bf16.msra.mxu1 %v1608_v30 }
  0x8c   : > { %1473 = vmatprep.subr.bf16.mxu1 %v1609_v31 }
  0x8f   : > { %1474 = vmatpush3.bf16.msra.mxu1 %v1609_v31 }
  0x92   : > { %1432 = vmatmul.mubr.bf16.gmra.mrb[4].mxu0 %v1589_v11 }
  0x93   : > { %1435 = vmatprep.mubr.bf16.mxu0 %v1590_v12 }
  0x9a   : > { %1436 = vmatmul.mubr.bf16.gmra.mrb[8].mxu0 %v1591_v13 }
  0x9b   : > { %1439 = vmatprep.mubr.bf16.mxu0 %v1592_v14 }
  0xa2   : > { %1440 = vmatmul.mubr.bf16.gmra.mrb[12].mxu0 %v1593_v15 }
  0xa3   : > { %1443 = vmatprep.mubr.bf16.mxu0 %v1594_v16 }
  0xaa   : > { %1444 = vmatmul.mubr.bf16.gmra.mrb[16].mxu0 %v1595_v17 }
  0xab   : > { %1447 = vmatprep.mubr.bf16.mxu0 %v1596_v18 }
  0xb2   : > { %1448 = vmatmul.mubr.bf16.gmra.mrb[20].mxu0 %v1597_v19 }
  0xb3   : > { %1451 = vmatprep.mubr.bf16.mxu0 %v1598_v20 }
  0xba   : > { %1452 = vmatmul.mubr.bf16.gmra.mrb[24].mxu0 %v1599_v21 }
  0xbb   : > { %1455 = vmatprep.mubr.bf16.mxu0 %v1600_v22 }
  0xc2   : > { %1456 = vmatmul.mubr.bf16.gmra.mrb[28].mxu0 %v1601_v23 }
 0x15d   : > { %v1429_v33 = vpop.f32.mrb[0].mxu0 }
 0x15e   : > { %v517_v34 = vadd.f32 %v1429_v33, %v2084_v32  ;;  %v508_v35 = vpop.f32.mrb[1].mxu0 }
 0x15f   : > { %v2088_v36 = vadd.f32 %v2084_v32, %v508_v35  ;;  %v1430_v37 = vpop.f32.mrb[2].mxu0 }
 0x160   : > { %v669_v38 = vmul.f32 0.044715, %v517_v34  ;;  %v2091_v39 = vadd.f32 %v1430_v37, %v2084_v32  ;;  %v511_v40 = vpop.f32.mrb[3].mxu0  ;;  %v637_v25 = vmul.f32 0.5, %v517_v34 }
 0x161   : > { %v667_v41 = vmul.f32 0.044715, %v2088_v36  ;;  %v2095_v42 = vadd.f32 %v2084_v32, %v511_v40  ;;  %v635_v33 = vmul.f32 0.5, %v2088_v36 }
 0x162   : > { %v701_v43 = vmul.f32 %v669_v38, %v517_v34  ;;  %v670_v44 = vmul.f32 0.044715, %v2091_v39 }
 0x163   : > { %v668_v45 = vmul.f32 0.044715, %v2095_v42  ;;  %v699_v46 = vmul.f32 %v667_v41, %v2088_v36 }
 0x164   : > { %v733_v47 = vmul.f32 %v701_v43, %v517_v34  ;;  %v702_v48 = vmul.f32 %v670_v44, %v2091_v39  ;;  %v636_v44 = vmul.f32 0.5, %v2095_v42 }
 0x165   : > { %v1433_v49 = vpop.f32.mrb[4].mxu0  ;;  %v700_v50 = vmul.f32 %v668_v45, %v2095_v42  ;;  %v731_v51 = vmul.f32 %v699_v46, %v2088_v36  ;;  %v638_v45 = vmul.f32 0.5, %v2091_v39 }
 0x166   : > { %v734_v52 = vmul.f32 %v702_v48, %v2091_v39  ;;  %v2105_v53 = vadd.f32 %v1433_v49, %v2084_v32  ;;  %v524_v54 = vpop.f32.mrb[5].mxu0  ;;  %v765_v55 = vadd.f32 %v733_v47, %v517_v34 }
 0x167   : > { %v525_v56 = vadd.f32 %v2084_v32, %v524_v54  ;;  %v1434_v57 = vpop.f32.mrb[6].mxu0  ;;  %v732_v58 = vmul.f32 %v700_v50, %v2095_v42  ;;  %v763_v59 = vadd.f32 %v731_v51, %v2088_v36 }
 0x168   : > { %v673_v60 = vmul.f32 0.044715, %v2105_v53  ;;  %v2112_v61 = vadd.f32 %v1434_v57, %v2084_v32  ;;  %v527_v62 = vpop.f32.mrb[7].mxu0  ;;  %v766_v63 = vadd.f32 %v734_v52, %v2091_v39  ;;  %v797_v0 = vmul.f32 0.7978846, %v765_v55 }
 0x169   : > { %v671_v1 = vmul.f32 0.044715, %v525_v56  ;;  %v528_v2 = vadd.f32 %v2084_v32, %v527_v62  ;;  %v764_v3 = vadd.f32 %v732_v58, %v2095_v42  ;;  %v795_v4 = vmul.f32 0.7978846, %v763_v59 }
 0x16a   : > { %v705_v5 = vmul.f32 %v673_v60, %v2105_v53  ;;  %v674_v6 = vmul.f32 0.044715, %v2112_v61  ;;  %v798_v7 = vmul.f32 0.7978846, %v766_v63  ;;  %1610 = vtanh.f32 %v797_v0 }
 0x16b   : > { %v703_v8 = vmul.f32 %v671_v1, %v525_v56  ;;  %v672_v9 = vmul.f32 0.044715, %v528_v2  ;;  %v796_v10 = vmul.f32 0.7978846, %v764_v3  ;;  %1612 = vtanh.f32 %v795_v4 }
 0x16c   : > { %v737_v11 = vmul.f32 %v705_v5, %v2105_v53  ;;  %v706_v12 = vmul.f32 %v674_v6, %v2112_v61  ;;  %1614 = vtanh.f32 %v798_v7  ;;  %v2144_v49 = vmul.f32 0.5, %v525_v56 }
 0x16d   : > { %v735_v13 = vmul.f32 %v703_v8, %v525_v56  ;;  %v704_v14 = vmul.f32 %v672_v9, %v528_v2  ;;  %v1437_v15 = vpop.f32.mrb[8].mxu0  ;;  %1616 = vtanh.f32 %v796_v10  ;;  %v640_v55 = vmul.f32 0.5, %v528_v2 }
 0x16e   : > { %v738_v16 = vmul.f32 %v706_v12, %v2112_v61  ;;  %v540_v17 = vpop.f32.mrb[9].mxu0  ;;  %v769_v22 = vadd.f32 %v737_v11, %v2105_v53  ;;  %v2127_v23 = vadd.f32 %v1437_v15, %v2084_v32  ;;  %v641_v1 = vmul.f32 0.5, %v2105_v53 }
 0x16f   : > { %v736_v18 = vmul.f32 %v704_v14, %v528_v2  ;;  %v2123_v19 = vadd.f32 %v2084_v32, %v540_v17  ;;  %v1438_v20 = vpop.f32.mrb[10].mxu0  ;;  %v767_v21 = vadd.f32 %v735_v13, %v525_v56  ;;  %v642_v8 = vmul.f32 0.5, %v2112_v61 }
 0x170   : > { %v543_v24 = vpop.f32.mrb[11].mxu0  ;;  %v770_v26 = vadd.f32 %v738_v16, %v2112_v61  ;;  %v2135_v31 = vadd.f32 %v1438_v20, %v2084_v32  ;;  %v801_v35 = vmul.f32 0.7978846, %v769_v22  ;;  %v677_v43 = vmul.f32 0.044715, %v2127_v23 }
 0x171   : > { %v675_v27 = vmul.f32 0.044715, %v2123_v19  ;;  %v2132_v28 = vadd.f32 %v2084_v32, %v543_v24  ;;  %v768_v29 = vadd.f32 %v736_v18, %v528_v2  ;;  %v799_v30 = vmul.f32 0.7978846, %v767_v21 }
 0x172   : > { %v802_v37 = vmul.f32 0.7978846, %v770_v26  ;;  %v678_v42 = vmul.f32 0.044715, %v2135_v31  ;;  %v709_v56 = vmul.f32 %v677_v43, %v2127_v23  ;;  %v2166_v53 = vmul.f32 0.5, %v2127_v23 }
 0x173   : > { %v707_v38 = vmul.f32 %v675_v27, %v2123_v19  ;;  %v676_v34 = vmul.f32 0.044715, %v2132_v28  ;;  %v800_v40 = vmul.f32 0.7978846, %v768_v29  ;;  %1618 = vtanh.f32 %v799_v30 }
 0x174   : > { %v1611_v41 = vpop.eup %1610  ;;  %1620 = vtanh.f32 %v801_v35  ;;  %v710_v10 = vmul.f32 %v678_v42, %v2135_v31  ;;  %v741_v18 = vmul.f32 %v709_v56, %v2127_v23  ;;  %v2179_v29 = vmul.f32 0.5, %v2123_v19 }
 0x175   : > { %v1613_v46 = vpop.eup %1612  ;;  %v708_v47 = vmul.f32 %v676_v34, %v2132_v28  ;;  %v1441_v36 = vpop.f32.mrb[12].mxu0  ;;  %v861_v48 = vadd.f32 1.0, %v1611_v41  ;;  %1622 = vtanh.f32 %v800_v40  ;;  %v739_v51 = vmul.f32 %v707_v38, %v2123_v19 }
 0x176   : > { %v1615_v50 = vpop.eup %1614  ;;  %v556_v52 = vpop.f32.mrb[13].mxu0  ;;  %v859_v54 = vadd.f32 1.0, %v1613_v46  ;;  %1624 = vtanh.f32 %v802_v37  ;;  %v2154_v62 = vadd.f32 %v1441_v36, %v2084_v32 }
 0x177   : > { %v1617_v57 = vpop.eup %1616  ;;  %v740_v39 = vmul.f32 %v708_v47, %v2132_v28  ;;  %v2150_v58 = vadd.f32 %v2084_v32, %v556_v52  ;;  %v1442_v59 = vpop.f32.mrb[14].mxu0  ;;  %v862_v60 = vadd.f32 1.0, %v1615_v50  ;;  %v893_v4 = vmul.f32 %v861_v48, %v637_v25 }
 0x178   : > { %v559_v63 = vpop.f32.mrb[15].mxu0  ;;  %v860_v0 = vadd.f32 1.0, %v1617_v57  ;;  %v891_v6 = vmul.f32 %v859_v54, %v635_v33  ;;  %v771_v9 = vadd.f32 %v739_v51, %v2123_v19  ;;  %v681_v13 = vmul.f32 0.044715, %v2154_v62 }
 0x179   : > { %v679_v2 = vmul.f32 0.044715, %v2150_v58  ;;  %v2159_v3 = vadd.f32 %v2084_v32, %v559_v63  ;;  %v894_v5 = vmul.f32 %v862_v60, %v638_v45  ;;  %v772_v12 = vadd.f32 %v740_v39, %v2132_v28 }
 0x17a   : > { %v892_v7 = vmul.f32 %v860_v0, %v636_v44  ;;  %v803_v16 = vmul.f32 0.7978846, %v771_v9  ;;  %v2173_v20 = vadd.f32 %v1442_v59, %v2084_v32  ;;  %v742_v33 = vmul.f32 %v710_v10, %v2135_v31 }
 0x17b   : > { %v924_v11 = vpack.c.bf16 %v894_v5, %v893_v4  ;;  %v680_v14 = vmul.f32 0.044715, %v2159_v3  ;;  %v711_v61 = vmul.f32 %v679_v2, %v2150_v58  ;;  %v804_v22 = vmul.f32 0.7978846, %v772_v12 }
 0x17c   : > { %v923_v15 = vpack.c.bf16 %v892_v7, %v891_v6  ;;  %1626 = vtanh.f32 %v803_v16  ;;  %v713_v40 = vmul.f32 %v681_v13, %v2154_v62  ;;  %v682_v46 = vmul.f32 0.044715, %v2173_v20 }
 0x17d   : > { %v1619_v17 = vpop.eup %1618  ;;  %v1445_v21 = vpop.f32.mrb[16].mxu0  ;;  %1628 = vtanh.f32 %v804_v22  ;;  %v712_v41 = vmul.f32 %v680_v14, %v2159_v3  ;;  %v743_v45 = vmul.f32 %v711_v61, %v2150_v58  ;;  %v773_v52 = vadd.f32 %v741_v18, %v2127_v23 }
 0x17e   : > { %v1621_v24 = vpop.eup %1620  ;;  %v2176_v25 = vadd.f32 %v1445_v21, %v2084_v32  ;;  %v572_v26 = vpop.f32.mrb[17].mxu0  ;;  %1475 = vmatprep.mubr.bf16.mxu1 %v923_v15  ;;  %v863_v27 = vadd.f32 1.0, %v1619_v17  ;;  %v774_v39 = vadd.f32 %v742_v33, %v2135_v31  ;;  %v714_v0 = vmul.f32 %v682_v46, %v2173_v20 }
 0x17f   : > { %v1623_v30 = vpop.eup %1622  ;;  %v2183_v35 = vadd.f32 %v2084_v32, %v572_v26  ;;  %v1446_v37 = vpop.f32.mrb[18].mxu0  ;;  %1476 = vmatmul.mubr.bf16.vlgmr.msra.gmra.mrb[0].mxu1 %v924_v11  ;;  %v865_v38 = vadd.f32 1.0, %v1621_v24  ;;  %v744_v59 = vmul.f32 %v712_v41, %v2159_v3  ;;  %v805_v63 = vmul.f32 0.7978846, %v773_v52 }
 0x180   : > { %v1625_v34 = vpop.eup %1624  ;;  %v2188_v43 = vadd.f32 %v1446_v37, %v2084_v32  ;;  %v575_v19 = vpop.f32.mrb[19].mxu0  ;;  %v864_v44 = vadd.f32 1.0, %v1623_v30  ;;  %v685_v47 = vmul.f32 0.044715, %v2176_v25  ;;  %v895_v50 = vmul.f32 %v863_v27, %v2144_v49 }
 0x181   : > { %v866_v36 = vadd.f32 1.0, %v1625_v34  ;;  %v683_v48 = vmul.f32 0.044715, %v2183_v35  ;;  %v2197_v54 = vadd.f32 %v2084_v32, %v575_v19  ;;  %v897_v57 = vmul.f32 %v865_v38, %v641_v1 }
 0x182   : > { %v896_v51 = vmul.f32 %v864_v44, %v640_v55  ;;  %v686_v60 = vmul.f32 0.044715, %v2188_v43  ;;  %v644_v55 = vmul.f32 0.5, %v2132_v28  ;;  %v806_v23 = vmul.f32 0.7978846, %v774_v39 }
 0x183   : > { %v898_v42 = vmul.f32 %v866_v36, %v642_v8  ;;  %v745_v4 = vmul.f32 %v713_v40, %v2154_v62  ;;  %v717_v1 = vmul.f32 %v685_v47, %v2176_v25  ;;  %1630 = vtanh.f32 %v805_v63 }
 0x184   : > { %v925_v56 = vpack.c.bf16 %v896_v51, %v895_v50  ;;  %v715_v7 = vmul.f32 %v683_v48, %v2183_v35  ;;  %v684_v8 = vmul.f32 0.044715, %v2197_v54  ;;  %1632 = vtanh.f32 %v806_v23 }
 0x185   : > { %v1449_v2 = vpop.f32.mrb[20].mxu0  ;;  %v926_v49 = vpack.c.bf16 %v898_v42, %v897_v57  ;;  %v718_v11 = vmul.f32 %v686_v60, %v2188_v43  ;;  %v646_v13 = vmul.f32 0.5, %v2135_v31  ;;  %v775_v14 = vadd.f32 %v743_v45, %v2150_v58 }
 0x186   : > { %v2207_v5 = vadd.f32 %v1449_v2, %v2084_v32  ;;  %v588_v6 = vpop.f32.mrb[21].mxu0  ;;  %1479 = vmatprep.mubr.bf16.mxu1 %v925_v56  ;;  %v1627_v28 = vpop.eup %1626  ;;  %v776_v15 = vadd.f32 %v744_v59, %v2159_v3  ;;  %v746_v17 = vmul.f32 %v714_v0, %v2173_v20  ;;  %v2226_v22 = vmul.f32 %v717_v1, %v2176_v25 }
 0x187   : > { %v2212_v9 = vadd.f32 %v2084_v32, %v588_v6  ;;  %v1450_v10 = vpop.f32.mrb[22].mxu0  ;;  %1480 = vmatmul.mubr.bf16.gmra.mrb[4].mxu1 %v926_v49  ;;  %v1629_v16 = vpop.eup %1628  ;;  %v867_v21 = vadd.f32 1.0, %v1627_v28  ;;  %v807_v26 = vmul.f32 0.7978846, %v775_v14  ;;  %v747_v27 = vmul.f32 %v715_v7, %v2183_v35 }
 0x188   : > { %v591_v12 = vpop.f32.mrb[23].mxu0  ;;  %v2220_v18 = vadd.f32 %v1450_v10, %v2084_v32  ;;  %v689_v24 = vmul.f32 0.044715, %v2207_v5  ;;  %v868_v31 = vadd.f32 1.0, %v1629_v16  ;;  %v716_v30 = vmul.f32 %v684_v8, %v2197_v54 }
 0x189   : > { %v2223_v61 = vadd.f32 %v2084_v32, %v591_v12  ;;  %v687_v33 = vmul.f32 0.044715, %v2212_v9  ;;  %v808_v37 = vmul.f32 0.7978846, %v776_v15  ;;  %v2233_v38 = vmul.f32 %v718_v11, %v2188_v43 }
 0x18a   : > { %v899_v34 = vmul.f32 %v867_v21, %v2179_v29  ;;  %v900_v40 = vmul.f32 %v868_v31, %v644_v55  ;;  %1634 = vtanh.f32 %v807_v26  ;;  %v690_v41 = vmul.f32 0.044715, %v2220_v18 }
 0x18b   : > { %v688_v19 = vmul.f32 0.044715, %v2223_v61  ;;  %v2239_v45 = vmul.f32 0.5, %v2150_v58  ;;  %1636 = vtanh.f32 %v808_v37  ;;  %v721_v46 = vmul.f32 %v689_v24, %v2207_v5 }
 0x18c   : > { %v927_v48 = vpack.c.bf16 %v900_v40, %v899_v34  ;;  %v777_v29 = vadd.f32 %v745_v4, %v2154_v62  ;;  %v748_v50 = vmul.f32 %v716_v30, %v2197_v54  ;;  %v719_v51 = vmul.f32 %v687_v33, %v2212_v9 }
 0x18d   : > { %v1453_v44 = vpop.f32.mrb[24].mxu0  ;;  %v648_v57 = vmul.f32 0.5, %v2159_v3  ;;  %v778_v58 = vadd.f32 %v746_v17, %v2173_v20  ;;  %v1631_v42 = vpop.eup %1630  ;;  %v2257_v56 = vmul.f32 0.5, %v2154_v62  ;;  %v722_v2 = vmul.f32 %v690_v41, %v2220_v18 }
 0x18e   : > { %v2243_v47 = vadd.f32 %v1453_v44, %v2084_v32  ;;  %v604_v36 = vpop.f32.mrb[25].mxu0  ;;  %1483 = vmatprep.mubr.bf16.mxu1 %v927_v48  ;;  %v809_v63 = vmul.f32 0.7978846, %v777_v29  ;;  %v1633_v0 = vpop.eup %1632  ;;  %v720_v3 = vmul.f32 %v688_v19, %v2223_v61  ;;  %v869_v49 = vadd.f32 1.0, %v1631_v42 }
 0x18f   : > { %v1454_v52 = vpop.f32.mrb[26].mxu0  ;;  %v2251_v39 = vadd.f32 %v2084_v32, %v604_v36  ;;  %v810_v55 = vmul.f32 0.7978846, %v778_v58  ;;  %v2262_v23 = vmul.f32 %v721_v46, %v2207_v5  ;;  %v870_v4 = vadd.f32 1.0, %v1633_v0 }
 0x190   : > { %v2254_v59 = vadd.f32 %v1454_v52, %v2084_v32  ;;  %v607_v60 = vpop.f32.mrb[27].mxu0  ;;  %1638 = vtanh.f32 %v809_v63  ;;  %v751_v6 = vmul.f32 %v719_v51, %v2212_v9  ;;  %v693_v62 = vmul.f32 0.044715, %v2243_v47 }
 0x191   : > { %v2265_v1 = vadd.f32 %v2084_v32, %v607_v60  ;;  %v650_v7 = vmul.f32 0.5, %v2173_v20  ;;  %1640 = vtanh.f32 %v810_v55  ;;  %v691_v8 = vmul.f32 0.044715, %v2251_v39 }
 0x192   : > { %v901_v10 = vmul.f32 %v869_v49, %v2166_v53  ;;  %v902_v28 = vmul.f32 %v870_v4, %v646_v13  ;;  %v779_v11 = vadd.f32 %v747_v27, %v2183_v35  ;;  %v754_v12 = vmul.f32 %v722_v2, %v2220_v18 }
 0x193   : > { %v752_v14 = vmul.f32 %v720_v3, %v2223_v61  ;;  %v694_v15 = vmul.f32 0.044715, %v2254_v59  ;;  %v780_v17 = vadd.f32 %v748_v50, %v2197_v54  ;;  %v692_v20 = vmul.f32 0.044715, %v2265_v1 }
 0x194   : > { %v1635_v21 = vpop.eup %1634  ;;  %v928_v24 = vpack.c.bf16 %v902_v28, %v901_v10  ;;  %v811_v13 = vmul.f32 0.7978846, %v779_v11  ;;  %v725_v27 = vmul.f32 %v693_v62, %v2243_v47  ;;  %v723_v40 = vmul.f32 %v691_v8, %v2251_v39 }
 0x195   : > { %v1457_v16 = vpop.f32.mrb[28].mxu0  ;;  %v1637_v26 = vpop.eup %1636  ;;  %v871_v33 = vadd.f32 1.0, %v1635_v21  ;;  %v812_v34 = vmul.f32 0.7978846, %v780_v17  ;;  %v726_v46 = vmul.f32 %v694_v15, %v2254_v59  ;;  %v651_v48 = vmul.f32 0.5, %v2183_v35 }
 0x196   : > { %v2279_v31 = vadd.f32 %v1457_v16, %v2084_v32  ;;  %v620_v53 = vpop.f32.mrb[29].mxu0  ;;  %1484 = vmatmul.mubr.bf16.gmra.mrb[8].mxu1 %v928_v24  ;;  %v872_v41 = vadd.f32 1.0, %v1637_v26  ;;  %1642 = vtanh.f32 %v811_v13  ;;  %v724_v29 = vmul.f32 %v692_v20, %v2265_v1 }
 0x197   : > { %v2283_v30 = vadd.f32 %v2084_v32, %v620_v53  ;;  %v1458_v37 = vpop.f32.mrb[30].mxu0  ;;  %1644 = vtanh.f32 %v812_v34  ;;  %v903_v51 = vmul.f32 %v871_v33, %v2239_v45  ;;  %v781_v60 = vadd.f32 %v2226_v22, %v2176_v25 }
 0x198   : > { %v2287_v19 = vadd.f32 %v1458_v37, %v2084_v32  ;;  %v623_v44 = vpop.f32.mrb[31].mxu0  ;;  %v904_v52 = vmul.f32 %v872_v41, %v648_v57  ;;  %v697_v58 = vmul.f32 0.044715, %v2279_v31  ;;  %v757_v35 = vmul.f32 %v725_v27, %v2243_v47 }
 0x199   : > { %v2291_v36 = vadd.f32 %v2084_v32, %v623_v44  ;;  %v695_v50 = vmul.f32 0.044715, %v2283_v30  ;;  %v782_v32 = vadd.f32 %v2233_v38, %v2188_v43  ;;  %v755_v0 = vmul.f32 %v723_v40, %v2251_v39 }
 0x19a   : > { %v1639_v63 = vpop.eup %1638  ;;  %v929_v2 = vpack.c.bf16 %v904_v52, %v903_v51  ;;  %v652_v3 = vmul.f32 0.5, %v2197_v54  ;;  %v758_v57 = vmul.f32 %v726_v46, %v2254_v59  ;;  %v698_v49 = vmul.f32 0.044715, %v2287_v19 }
 0x19b   : > { %v696_v42 = vmul.f32 0.044715, %v2291_v36  ;;  %v1641_v45 = vpop.eup %1640  ;;  %v873_v55 = vadd.f32 1.0, %v1639_v63  ;;  %v813_v4 = vmul.f32 0.7978846, %v781_v60  ;;  %v727_v22 = vmul.f32 %v695_v50, %v2283_v30 }
 0x19c   : > { %1487 = vmatprep.mubr.bf16.mxu1 %v929_v2  ;;  %v874_v62 = vadd.f32 1.0, %v1641_v45  ;;  %v814_v8 = vmul.f32 0.7978846, %v782_v32  ;;  %v756_v10 = vmul.f32 %v724_v29, %v2265_v1  ;;  %v729_v28 = vmul.f32 %v697_v58, %v2279_v31 }
 0x19d   : > { %v728_v38 = vmul.f32 %v696_v42, %v2291_v36  ;;  %1646 = vtanh.f32 %v813_v4  ;;  %v783_v54 = vadd.f32 %v751_v6, %v2212_v9  ;;  %v905_v11 = vmul.f32 %v873_v55, %v2257_v56 }
 0x19e   : > { %v906_v15 = vmul.f32 %v874_v62, %v650_v7  ;;  %1648 = vtanh.f32 %v814_v8  ;;  %v784_v16 = vadd.f32 %v752_v14, %v2223_v61  ;;  %v730_v17 = vmul.f32 %v698_v49, %v2287_v19 }
 0x19f   : > { %v815_v21 = vmul.f32 0.7978846, %v783_v54  ;;  %v785_v24 = vadd.f32 %v2262_v23, %v2207_v5  ;;  %v786_v20 = vadd.f32 %v754_v12, %v2220_v18  ;;  %v759_v13 = vmul.f32 %v727_v22, %v2283_v30 }
 0x1a0   : > { %v1643_v53 = vpop.eup %1642  ;;  %v930_v26 = vpack.c.bf16 %v906_v15, %v905_v11  ;;  %v760_v6 = vmul.f32 %v728_v38, %v2291_v36  ;;  %v816_v27 = vmul.f32 0.7978846, %v784_v16  ;;  %v787_v34 = vadd.f32 %v755_v0, %v2251_v39 }
 0x1a1   : > { %v1645_v56 = vpop.eup %1644  ;;  %v875_v7 = vadd.f32 1.0, %v1643_v53  ;;  %1650 = vtanh.f32 %v815_v21  ;;  %v817_v33 = vmul.f32 0.7978846, %v785_v24  ;;  %v818_v14 = vmul.f32 0.7978846, %v786_v20 }
 0x1a2   : > { %1488 = vmatmul.mubr.bf16.gmra.mrb[12].mxu1 %v930_v26  ;;  %v876_v37 = vadd.f32 1.0, %v1645_v56  ;;  %1652 = vtanh.f32 %v816_v27  ;;  %v788_v23 = vadd.f32 %v756_v10, %v2265_v1  ;;  %v819_v41 = vmul.f32 0.7978846, %v787_v34 }
 0x1a3   : > { %v907_v12 = vmul.f32 %v875_v7, %v651_v48  ;;  %1654 = vtanh.f32 %v817_v33  ;;  %v761_v46 = vmul.f32 %v729_v28, %v2279_v31  ;;  %v762_v29 = vmul.f32 %v730_v17, %v2287_v19 }
 0x1a4   : > { %v908_v40 = vmul.f32 %v876_v37, %v652_v3  ;;  %1656 = vtanh.f32 %v818_v14  ;;  %v820_v44 = vmul.f32 0.7978846, %v788_v23  ;;  %v789_v50 = vadd.f32 %v757_v35, %v2243_v47 }
 0x1a5   : > { %v790_v51 = vadd.f32 %v758_v57, %v2254_v59  ;;  %1658 = vtanh.f32 %v819_v41  ;;  %v791_v58 = vadd.f32 %v759_v13, %v2283_v30  ;;  %v792_v42 = vadd.f32 %v760_v6, %v2291_v36 }
 0x1a6   : > { %v931_v52 = vpack.c.bf16 %v908_v40, %v907_v12  ;;  %v653_v60 = vmul.f32 0.5, %v2176_v25  ;;  %1660 = vtanh.f32 %v820_v44  ;;  %v821_v32 = vmul.f32 0.7978846, %v789_v50 }
 0x1a7   : > { %v1647_v48 = vpop.eup %1646  ;;  %v822_v63 = vmul.f32 0.7978846, %v790_v51  ;;  %v654_v2 = vmul.f32 0.5, %v2188_v43  ;;  %v823_v35 = vmul.f32 0.7978846, %v791_v58  ;;  %v793_v49 = vadd.f32 %v761_v46, %v2279_v31 }
 0x1a8   : > { %v1649_v0 = vpop.eup %1648  ;;  %1491 = vmatprep.mubr.bf16.mxu1 %v931_v52  ;;  %v877_v3 = vadd.f32 1.0, %v1647_v48  ;;  %v824_v45 = vmul.f32 0.7978846, %v792_v42  ;;  %1662 = vtanh.f32 %v821_v32  ;;  %v794_v55 = vadd.f32 %v762_v29, %v2287_v19 }
 0x1a9   : > { %v878_v57 = vadd.f32 1.0, %v1649_v0  ;;  %1664 = vtanh.f32 %v822_v63  ;;  %v825_v62 = vmul.f32 0.7978846, %v793_v49  ;;  %v655_v10 = vmul.f32 0.5, %v2212_v9 }
 0x1aa   : > { %v909_v4 = vmul.f32 %v877_v3, %v653_v60  ;;  %1666 = vtanh.f32 %v823_v35  ;;  %v826_v38 = vmul.f32 0.7978846, %v794_v55  ;;  %v656_v11 = vmul.f32 0.5, %v2223_v61 }
 0x1ab   : > { %v1651_v22 = vpop.eup %1650  ;;  %v910_v25 = vmul.f32 %v878_v57, %v654_v2  ;;  %1668 = vtanh.f32 %v824_v45  ;;  %v657_v17 = vmul.f32 0.5, %v2207_v5  ;;  %v658_v53 = vmul.f32 0.5, %v2220_v18 }
 0x1ac   : > { %v1653_v8 = vpop.eup %1652  ;;  %v879_v43 = vadd.f32 1.0, %v1651_v22  ;;  %1670 = vtanh.f32 %v825_v62  ;;  %v659_v61 = vmul.f32 0.5, %v2251_v39  ;;  %v660_v33 = vmul.f32 0.5, %v2265_v1 }
 0x1ad   : > { %v1655_v28 = vpop.eup %1654  ;;  %v932_v54 = vpack.c.bf16 %v910_v25, %v909_v4  ;;  %v880_v15 = vadd.f32 1.0, %v1653_v8  ;;  %1672 = vtanh.f32 %v826_v38  ;;  %v661_v41 = vmul.f32 0.5, %v2243_v47 }
 0x1ae   : > { %v1657_v16 = vpop.eup %1656  ;;  %v881_v21 = vadd.f32 1.0, %v1655_v28  ;;  %v911_v24 = vmul.f32 %v879_v43, %v655_v10  ;;  %v662_v44 = vmul.f32 0.5, %v2254_v59  ;;  %v663_v39 = vmul.f32 0.5, %v2283_v30 }
 0x1af   : > { %1492 = vmatmul.mubr.bf16.gmra.mrb[16].mxu1 %v932_v54  ;;  %v912_v20 = vmul.f32 %v880_v15, %v656_v11  ;;  %v882_v13 = vadd.f32 1.0, %v1657_v16  ;;  %v1659_v9 = vpop.eup %1658  ;;  %v664_v42 = vmul.f32 0.5, %v2291_v36  ;;  %v665_v47 = vmul.f32 0.5, %v2279_v31  ;;  %v2349_v36 = vld [vmem:[%s2472_s4] ss:$0 sm:$0xff] }
 0x1b0   : > { %v1661_v26 = vpop.eup %1660  ;;  %v913_v27 = vmul.f32 %v881_v21, %v657_v17  ;;  %v883_v7 = vadd.f32 1.0, %v1659_v9  ;;  %v666_v59 = vmul.f32 0.5, %v2287_v19 }
 0x1b1   : > { %v933_v6 = vpack.c.bf16 %v912_v20, %v911_v24  ;;  %v914_v56 = vmul.f32 %v882_v13, %v658_v53  ;;  %v884_v14 = vadd.f32 1.0, %v1661_v26 }
 0x1b2   : > { %v1663_v5 = vpop.eup %1662  ;;  %v915_v23 = vmul.f32 %v883_v7, %v659_v61 }
 0x1b3   : > { %1495 = vmatprep.mubr.bf16.mxu1 %v933_v6  ;;  %v934_v37 = vpack.c.bf16 %v914_v56, %v913_v27  ;;  %v1665_v34 = vpop.eup %1664  ;;  %v916_v12 = vmul.f32 %v884_v14, %v660_v33  ;;  %v885_v40 = vadd.f32 1.0, %v1663_v5 }
 0x1b4   : > { %v1667_v18 = vpop.eup %1666  ;;  %v886_v46 = vadd.f32 1.0, %v1665_v34 }
 0x1b5   : > { %v1669_v29 = vpop.eup %1668  ;;  %v935_v50 = vpack.c.bf16 %v916_v12, %v915_v23  ;;  %v887_v51 = vadd.f32 1.0, %v1667_v18  ;;  %v917_v52 = vmul.f32 %v885_v40, %v661_v41 }
 0x1b6   : > { %v1671_v1 = vpop.eup %1670  ;;  %v918_v58 = vmul.f32 %v886_v46, %v662_v44  ;;  %v888_v48 = vadd.f32 1.0, %v1669_v29 }
 0x1b7   : > { %1496 = vmatmul.mubr.bf16.gmra.mrb[20].mxu1 %v934_v37  ;;  %v1673_v60 = vpop.eup %1672  ;;  %v889_v32 = vadd.f32 1.0, %v1671_v1  ;;  %v919_v0 = vmul.f32 %v887_v51, %v663_v39 }
 0x1b8   : > { %1499 = vmatprep.mubr.bf16.mxu1 %v935_v50  ;;  %v936_v63 = vpack.c.bf16 %v918_v58, %v917_v52  ;;  %v920_v2 = vmul.f32 %v888_v48, %v664_v42  ;;  %v890_v30 = vadd.f32 1.0, %v1673_v60 }
 0x1b9   : > { %v921_v35 = vmul.f32 %v889_v32, %v665_v47 }
 0x1ba   : > { %v937_v3 = vpack.c.bf16 %v920_v2, %v919_v0  ;;  %v922_v45 = vmul.f32 %v890_v30, %v666_v59 }
 0x1bc   : > { %v938_v57 = vpack.c.bf16 %v922_v45, %v921_v35 }
 0x1bf   : > { %1500 = vmatmul.mubr.bf16.gmra.mrb[24].mxu1 %v936_v63 }
 0x1c0   : > { %1503 = vmatprep.mubr.bf16.mxu1 %v937_v3 }
 0x1c7   : > { %1504 = vmatmul.mubr.bf16.gmra.mrb[28].mxu1 %v938_v57 }
 0x252   : > { %v1477_v31 = vpop.f32.mrb[0].mxu1 }
 0x253   : > { %v1053_v19 = vadd.f32 %v1477_v31, %v2349_v36  ;;  %v1044_v49 = vpop.f32.mrb[1].mxu1 }
 0x254   : > { %v1045_v55 = vadd.f32 %v2349_v36, %v1044_v49  ;;  %v1478_v4 = vpop.f32.mrb[2].mxu1 }
 0x255   : > { %1173 = vst [vmem:[%s2353_s28 + $0x10] sm:$0xff] %v1053_v19  ;;  %v1056_v22 = vadd.f32 %v1478_v4, %v2349_v36  ;;  %v1047_v25 = vpop.f32.mrb[3].mxu1 }
 0x256   : > { %1171 = vst [vmem:[%s2353_s28] sm:$0xff] %v1045_v55  ;;  %v1048_v62 = vadd.f32 %v2349_v36, %v1047_v25 }
 0x257   : > { %1174 = vst [vmem:[%s2353_s28 + $0x18] sm:$0xff] %v1056_v22 }
 0x258   : > { %1172 = vst [vmem:[%s2353_s28 + $0x8] sm:$0xff] %v1048_v62 }
 0x25a   : > { %v1481_v38 = vpop.f32.mrb[4].mxu1 }
 0x25b   : > { %v1069_v8 = vadd.f32 %v1481_v38, %v2349_v36  ;;  %v1060_v10 = vpop.f32.mrb[5].mxu1 }
 0x25c   : > { %v1061_v43 = vadd.f32 %v2349_v36, %v1060_v10  ;;  %v1482_v28 = vpop.f32.mrb[6].mxu1 }
 0x25d   : > { %1177 = vst [vmem:[%s2353_s28 + $0x30] sm:$0xff] %v1069_v8  ;;  %v1072_v54 = vadd.f32 %v1482_v28, %v2349_v36  ;;  %v1063_v11 = vpop.f32.mrb[7].mxu1 }
 0x25e   : > { %1175 = vst [vmem:[%s2353_s28 + $0x20] sm:$0xff] %v1061_v43  ;;  %v1064_v15 = vadd.f32 %v2349_v36, %v1063_v11 }
 0x25f   : > { %1178 = vst [vmem:[%s2353_s28 + $0x38] sm:$0xff] %v1072_v54 }
 0x260   : > { %1176 = vst [vmem:[%s2353_s28 + $0x28] sm:$0xff] %v1064_v15 }
 0x269   : > { %v1485_v16 = vpop.f32.mrb[8].mxu1 }
 0x26a   : > { %v1085_v17 = vadd.f32 %v1485_v16, %v2349_v36  ;;  %v1076_v21 = vpop.f32.mrb[9].mxu1 }
 0x26b   : > { %v1077_v24 = vadd.f32 %v2349_v36, %v1076_v21  ;;  %v1486_v20 = vpop.f32.mrb[10].mxu1 }
 0x26c   : > { %1181 = vst [vmem:[%s2353_s28 + $0x50] sm:$0xff] %v1085_v17  ;;  %v1088_v53 = vadd.f32 %v1486_v20, %v2349_v36  ;;  %v1079_v13 = vpop.f32.mrb[11].mxu1 }
 0x26d   : > { %1179 = vst [vmem:[%s2353_s28 + $0x40] sm:$0xff] %v1077_v24  ;;  %v1080_v9 = vadd.f32 %v2349_v36, %v1079_v13 }
 0x26e   : > { %1182 = vst [vmem:[%s2353_s28 + $0x58] sm:$0xff] %v1088_v53 }
 0x26f   : > { %1180 = vst [vmem:[%s2353_s28 + $0x48] sm:$0xff] %v1080_v9 }
 0x275   : > { %v1489_v26 = vpop.f32.mrb[12].mxu1 }
 0x276   : > { %v1101_v6 = vadd.f32 %v1489_v26, %v2349_v36  ;;  %v1092_v27 = vpop.f32.mrb[13].mxu1 }
 0x277   : > { %v1093_v56 = vadd.f32 %v2349_v36, %v1092_v27  ;;  %v1490_v7 = vpop.f32.mrb[14].mxu1 }
 0x278   : > { %1185 = vst [vmem:[%s2353_s28 + $0x70] sm:$0xff] %v1101_v6  ;;  %v1104_v61 = vadd.f32 %v1490_v7, %v2349_v36  ;;  %v1095_v33 = vpop.f32.mrb[15].mxu1 }
 0x279   : > { %1183 = vst [vmem:[%s2353_s28 + $0x60] sm:$0xff] %v1093_v56  ;;  %v1096_v14 = vadd.f32 %v2349_v36, %v1095_v33 }
 0x27a   : > { %1186 = vst [vmem:[%s2353_s28 + $0x78] sm:$0xff] %v1104_v61 }
 0x27b   : > { %1184 = vst [vmem:[%s2353_s28 + $0x68] sm:$0xff] %v1096_v14 }
 0x282   : > { %v1493_v5 = vpop.f32.mrb[16].mxu1 }
 0x283   : > { %v1117_v37 = vadd.f32 %v1493_v5, %v2349_v36  ;;  %v1108_v34 = vpop.f32.mrb[17].mxu1 }
 0x284   : > { %v1109_v23 = vadd.f32 %v2349_v36, %v1108_v34  ;;  %v1494_v12 = vpop.f32.mrb[18].mxu1 }
 0x285   : > { %1189 = vst [vmem:[%s2353_s28 + $0x90] sm:$0xff] %v1117_v37  ;;  %v1120_v40 = vadd.f32 %v1494_v12, %v2349_v36  ;;  %v1111_v18 = vpop.f32.mrb[19].mxu1 }
 0x286   : > { %1187 = vst [vmem:[%s2353_s28 + $0x80] sm:$0xff] %v1109_v23  ;;  %v1112_v41 = vadd.f32 %v2349_v36, %v1111_v18 }
 0x287   : > { %1190 = vst [vmem:[%s2353_s28 + $0x98] sm:$0xff] %v1120_v40 }
 0x288   : > { %1188 = vst [vmem:[%s2353_s28 + $0x88] sm:$0xff] %v1112_v41 }
 0x28a   : > { %v1497_v44 = vpop.f32.mrb[20].mxu1 }
 0x28b   : > { %v1133_v46 = vadd.f32 %v1497_v44, %v2349_v36  ;;  %v1124_v29 = vpop.f32.mrb[21].mxu1 }
 0x28c   : > { %v1125_v50 = vadd.f32 %v2349_v36, %v1124_v29  ;;  %v1498_v39 = vpop.f32.mrb[22].mxu1 }
 0x28d   : > { %1193 = vst [vmem:[%s2353_s28 + $0xb0] sm:$0xff] %v1133_v46  ;;  %v1136_v51 = vadd.f32 %v1498_v39, %v2349_v36  ;;  %v1127_v1 = vpop.f32.mrb[23].mxu1 }
 0x28e   : > { %1191 = vst [vmem:[%s2353_s28 + $0xa0] sm:$0xff] %v1125_v50  ;;  %v1128_v52 = vadd.f32 %v2349_v36, %v1127_v1 }
 0x28f   : > { %1194 = vst [vmem:[%s2353_s28 + $0xb8] sm:$0xff] %v1136_v51 }
 0x290   : > { %1192 = vst [vmem:[%s2353_s28 + $0xa8] sm:$0xff] %v1128_v52 }
 0x292   : > { %v1501_v58 = vpop.f32.mrb[24].mxu1 }
 0x293   : > { %v1149_v42 = vadd.f32 %v1501_v58, %v2349_v36  ;;  %v1140_v48 = vpop.f32.mrb[25].mxu1 }
 0x294   : > { %v1141_v60 = vadd.f32 %v2349_v36, %v1140_v48  ;;  %v1502_v47 = vpop.f32.mrb[26].mxu1 }
 0x295   : > { %1197 = vst [vmem:[%s2353_s28 + $0xd0] sm:$0xff] %v1149_v42  ;;  %v1152_v59 = vadd.f32 %v1502_v47, %v2349_v36  ;;  %v1143_v32 = vpop.f32.mrb[27].mxu1 }
 0x296   : > { %1195 = vst [vmem:[%s2353_s28 + $0xc0] sm:$0xff] %v1141_v60  ;;  %v1144_v63 = vadd.f32 %v2349_v36, %v1143_v32 }
 0x297   : > { %1198 = vst [vmem:[%s2353_s28 + $0xd8] sm:$0xff] %v1152_v59 }
 0x298   : > { %1196 = vst [vmem:[%s2353_s28 + $0xc8] sm:$0xff] %v1144_v63 }
 0x29a   : > { %v1505_v0 = vpop.f32.mrb[28].mxu1 }
 0x29b   : > { %v1165_v2 = vadd.f32 %v1505_v0, %v2349_v36  ;;  %v1156_v30 = vpop.f32.mrb[29].mxu1 }
 0x29c   : > { %v1157_v3 = vadd.f32 %v2349_v36, %v1156_v30  ;;  %v1506_v35 = vpop.f32.mrb[30].mxu1 }
 0x29d   : > { %1201 = vst [vmem:[%s2353_s28 + $0xf0] sm:$0xff] %v1165_v2  ;;  %v1168_v45 = vadd.f32 %v1506_v35, %v2349_v36  ;;  %v1159_v57 = vpop.f32.mrb[31].mxu1 }
 0x29e   : > { %1199 = vst [vmem:[%s2353_s28 + $0xe0] sm:$0xff] %v1157_v3  ;;  %v1160_v31 = vadd.f32 %v2349_v36, %v1159_v57 }
 0x29f   : > { %1202 = vst [vmem:[%s2353_s28 + $0xf8] sm:$0xff] %v1168_v45 }
 0x2a0   : > { %1200 = vst [vmem:[%s2353_s28 + $0xe8] sm:$0xff] %v1160_v31 }
 0x2a1   : > { %1773 = shalt.err (!%p1770_p1)
}
 0x2a2   : > { %s1774_s24 = scalar_lea.hbm %s2418_s17, 4096  ;;  %s1778_s16 = scalar_lea.hbm %s2473_s5, 8192 }
 0x2a3   : > { %p1775_p13 = scmp.ne.s32.totalorder %s2418_s17, %s1774_s24  ;;  %p1779_p4 = scmp.lt.u32.totalorder %s2418_s17, %s2473_s5 }
 0x2a4   : > { %p1780_p5 = scmp.lt.u32.totalorder %s1778_s16, %s1774_s24  ;;  %p1782_p11 = scmp.lt.u32.totalorder %s1774_s24, %s2418_s17 }
 0x2a5   : > { %p1776_p6 = pnand %p1775_p13, %p2487_p0 }
 0x2a6   : > { %p1781_p8 = por %p1780_p5, %p1779_p4 }
 0x2a7   : > { %p1777_p10 = pneg %p1776_p6 }
 0x2a8   : > { %p1783_p2 = por %p1782_p11, %p1781_p8 }
 0x2aa   : > { %p1784_p3 = pnand %p1783_p2, %p1777_p10 }
 0x2ac   : > { %1787 = shalt.err (!%p1784_p3)
}
 0x2ad   : > { %s1838_s12 = smov 128   ;;  %s1839_s30 = smov 8  }
 0x2ae   : > { %1517 = dma.vmem_to_hbm [thread:$0]  (%p2487_p0), %s2420_s13, 4096, %s2418_s17, %s1204_s22, %s1838_s12, %s1838_s12, %s1839_s30  }
 0x2af PF: > { %s1232_s11 = sand.u32 1, %s1818_s18   ;;  %p2488_p7 = scmp.ne.s32.totalorder %s2478_s25, 0 }
 0x2b0   : > { %p2489_p9 = scmp.ge.s32.totalorder %s1830_s21, 2  ;;  %s1233_s7 = scalar_lea.sflag [#allocation4], %s1232_s11 }
 0x2b2   : > { %p1531_p12 = pnand %p2489_p9, %p2488_p7 }
 0x2b4   : > { %1813 = dma.done.wait (!%p1531_p12), %s1233_s7, 4096  }
 0x2b5   : > { %1815 = vsyncadd (!%p1531_p12), %s1233_s7, 4294963200  ;;  %p19_p1 = scmp.ge.s32.totalorder %s1986_s29, 4   ;;  %s2490_s18 = smov %s1822_s19 }
 0x2b6   : > { %s2491_s19 = smov %s1826_s20  ;;  %s2492_s20 = smov %s2002_s27 }
 0x2b7   : > { %s2493_s21 = smov %s1986_s29  ;;  %21 = sbr.rel (!%p19_p1) target bundleno = 6 (0x6), region = 93 }
 0x2be   :  { %1238 = vsyncpa [#allocation3], 1 }
 0x2bf   :  { %1240 = vsyncpa [#allocation3 + $0x1], 1 }
 0x2c0   :  { %1241 = vsyncpa [#allocation6], 1 }
 0x2c1   :  { %1242 = vsyncpa [#allocation4], 1 }
 0x2c2   :  { %1244 = vsyncpa [#allocation4 + $0x1], 1 }

</bundles_post_ra>
